<compile_context>
chip_gen: v7x
topology: tpu7x:2x2x1
jax: 0.10.0
libtpu: 0.0.40
codegen_flags: <defaults>
</compile_context>

<pallas_src>
import jax
import jax.numpy as jnp
from jax.experimental import pallas as pl
from jax.experimental.pallas import tpu as pltpu

HI = jax.lax.Precision.HIGHEST  # exact-f32 reference / host-side weight folding


# ----------------------------------------------------------------------------
# Packed-weight layout: one (R, W) f32 array, every sub-block starts on an
# 8-row (sublane-tile) boundary so in-kernel static slices are aligned.
# ----------------------------------------------------------------------------
def _pack_layout(E, T, H, hs):
    W = max(2 * H, H * hs, E)
    blocks = (('A', E), ('b0', 1), ('wv', E), ('vmask', H * T),
              ('wp', 1), ('wproj', H * E), ('bias', 1))
    offs, r = {}, 0
    for name, rows in blocks:
        offs[name] = r
        r = ((r + rows + 7) // 8) * 8
    return offs, r, W


def _make_kernel(B, E, T, H, hs):
    offs, _, _ = _pack_layout(E, T, H, hs)
    HS, HT, H2 = H * hs, H * T, 2 * H
    oA, ob, ov, om, owp, opr, obi = (offs[k] for k in
                                     ('A', 'b0', 'wv', 'vmask', 'wp', 'wproj', 'bias'))

    def kernel(x_ref, tok_ref, w_ref, out_ref):
        x = x_ref[...]                                       # (B, E)
        tok = tok_ref[...]                                   # (T, E)

        # --- static, 8-aligned slices of the single packed weight block -------
        A     = w_ref[oA:oA + E, :H2]                        # (E, 2H)   folded k/q score weights
        b0    = w_ref[ob:ob + 1, :H2]                        # (1, 2H)
        wv    = w_ref[ov:ov + E, :HS]                        # (E, H*hs) fused value projection
        vmask = w_ref[om:om + HT, :HS]                       # (H*T, H*hs) 0/1 block-diag mask
        wp    = w_ref[owp:owp + 1, :HS]                      # (1, H*hs) per-head hs->1 weights
        wpr   = w_ref[opr:opr + H * E, :E]                   # (H*E, E)  final projection (W^T)
        bias  = w_ref[obi:obi + 1, :E]                       # (1, E)    bproj + folded head bias

        # --- rank-1 scores for ALL heads from one tiny matmul ------------------
        # sct row h = s_h(t), row H+h = c_h(t); wei = x*s + c
        sct = (jnp.dot(tok, A, preferred_element_type=jnp.float32) + b0).T   # (2H, T)
        s = jnp.concatenate([sct[h:h + 1, :] for h in range(H)], axis=1)     # (1, H*T)
        c = jnp.concatenate([sct[H + h:H + h + 1, :] for h in range(H)], axis=1)

        # --- all-head scores + ONE softmax over the embedding axis (dim=-2) ----
        wei = x[:, :, None] * s[None, :, :] + c[None, :, :]                  # (B, E, H*T)
        m = jnp.max(wei, axis=1, keepdims=True)
        p = jnp.exp(wei - m)
        wei = p / jnp.sum(p, axis=1, keepdims=True)

        # --- ONE block-diagonal matmul for wei @ v over all heads --------------
        v_all = jnp.tanh(jnp.dot(tok, wv, preferred_element_type=jnp.float32))   # (T, H*hs)
        v_bd = jnp.concatenate([v_all] * H, axis=0) * vmask                       # (H*T, H*hs)
        o = jnp.tanh(jnp.dot(wei.reshape(B * E, HT), v_bd,
                             preferred_element_type=jnp.float32))                 # (B*E, H*hs)
        o = o.reshape(B, E, HS)                                                   # benign split

        # --- hs -> 1 head projection, kept in registers; h-major lane concat ---
        cat = jnp.concatenate(
            [jnp.sum(o[:, :, h * hs:(h + 1) * hs] * wp[:, h * hs:(h + 1) * hs][None],
                     axis=-1)
             for h in range(H)], axis=-1)                                         # (B, H*E)

        # --- single final projection -------------------------------------------
        out_ref[...] = jnp.dot(cat, wpr, preferred_element_type=jnp.float32) + bias

    return kernel


def multi_head_attention(x, tok_emb, w_packed, H, hs):
    B, E = x.shape
    T = tok_emb.shape[0]
    vmem = pl.BlockSpec(memory_space=pltpu.MemorySpace.VMEM)
    return pl.pallas_call(
        _make_kernel(B, E, T, H, hs),
        out_shape=jax.ShapeDtypeStruct((B, E), jnp.float32),
        in_specs=[vmem, vmem, vmem],    # 3 prologue DMAs: x, tok_emb, packed weights
        out_specs=vmem,
    )(x, tok_emb, w_packed)


# ----------------------------------------------------------------------------
# Parameters (shaped like the PyTorch module) and host-side fusion / packing.
# ----------------------------------------------------------------------------
def init_params(key, E, H, hs):
    ks = jax.random.split(key, 9)
    return {
        'wk': jax.random.normal(ks[0], (H, E, hs), jnp.float32) * (E ** -0.5),
        'bk': jax.random.normal(ks[1], (H, 1, hs), jnp.float32) * 0.1,
        'wq': jax.random.normal(ks[2], (H, 1, hs), jnp.float32),
        'bq': jax.random.normal(ks[3], (H, 1, hs), jnp.float32) * 0.1,
        'wv': jax.random.normal(ks[4], (H, E, hs), jnp.float32) * (E ** -0.5),
        'wp': jax.random.normal(ks[5], (H, 1, hs), jnp.float32) * (hs ** -0.5),
        'bp': jax.random.normal(ks[6], (H, 1, 1), jnp.float32) * 0.1,
        'wproj': jax.random.normal(ks[7], (E, H * E), jnp.float32) * ((H * E) ** -0.5),
        'bproj': jax.random.normal(ks[8], (1, E), jnp.float32) * 0.1,
    }


def fuse_params(p, T):
    """Fold + pack all per-head weights into ONE (R, W) f32 block for the kernel."""
    H, E, hs = p['wk'].shape
    HS = H * hs
    scale = hs ** -0.5
    wq = p['wq'].reshape(H, hs)
    bq = p['bq'].reshape(H, hs)
    bk = p['bk'].reshape(H, hs)

    # Fold key projection + rank-1 query into score weights:
    #   wei[b,e,h,t] = x[b,e]*s[h,t] + c[h,t],  [s_h(t) | c_h(t)] = tok[t] @ A + b0
    A = jnp.concatenate(
        [scale * jnp.einsum('hed,hd->eh', p['wk'], wq, precision=HI),
         scale * jnp.einsum('hed,hd->eh', p['wk'], bq, precision=HI)], axis=1)   # (E, 2H)
    b0 = scale * jnp.concatenate(
        [jnp.sum(bk * wq, axis=-1), jnp.sum(bk * bq, axis=-1)])[None, :]          # (1, 2H)

    wv_all = jnp.transpose(p['wv'], (1, 0, 2)).reshape(E, HS)                     # (E, H*hs)
    vmask = jnp.kron(jnp.eye(H, dtype=jnp.float32),
                     jnp.ones((T, hs), jnp.float32))                              # (H*T, H*hs)
    wp_all = p['wp'].reshape(1, HS)                                               # (1, H*hs)
    wproj2 = p['wproj'].T                                                         # (H*E, E)
    # fold the per-head scalar proj bias bp into the final projection bias
    colsum = wproj2.reshape(H, E, E).sum(axis=1)                                  # (H, E)
    bproj_eff = p['bproj'] + jnp.sum(p['bp'].reshape(H, 1) * colsum,
                                     axis=0, keepdims=True)                       # (1, E)

    offs, R, W = _pack_layout(E, T, H, hs)
    packed = jnp.zeros((R, W), jnp.float32)
    for name, mat in (('A', A), ('b0', b0), ('wv', wv_all), ('vmask', vmask),
                      ('wp', wp_all), ('wproj', wproj2), ('bias', bproj_eff)):
        r, c = mat.shape
        packed = packed.at[offs[name]:offs[name] + r, :c].set(mat)
    return packed


def mha_reference(x, tok, p):
    """Pure-JAX mirror of the PyTorch forward (exact f32 matmuls) for verification."""
    H, _, hs = p['wk'].shape
    head_outs = []
    for h in range(H):
        k = jnp.dot(tok, p['wk'][h], precision=HI) + p['bk'][h]             # (T, hs)
        q = x[:, :, None] * p['wq'][h][None] + p['bq'][h][None]             # (B, E, hs)
        wei = jnp.einsum('beh,th->bet', q, k, precision=HI) * (hs ** -0.5)
        wei = jax.nn.softmax(wei, axis=-2)
        v = jnp.tanh(jnp.dot(tok, p['wv'][h], precision=HI))
        o = jnp.tanh(jnp.einsum('bet,th->beh', wei, v, precision=HI))
        ho = jnp.sum(o * p['wp'][h][None], axis=-1) + p['bp'][h][0, 0]
        head_outs.append(ho)
    cat = jnp.concatenate(head_outs, axis=-1)                               # (B, H*E)
    return jnp.dot(cat, p['wproj'].T, precision=HI) + p['bproj'][0]


if __name__ == "__main__":
    B, E, T, H, hs = 2, 16, 8, 4, 8   # batch, embdSize, tokens, nHead, headSize
    key = jax.random.PRNGKey(0)
    kx, kt, kp = jax.random.split(key, 3)
    x = jax.random.normal(kx, (B, E), jnp.float32)
    tok_emb = jax.random.normal(kt, (T, E), jnp.float32)
    params = init_params(kp, E, H, hs)
    w_packed = fuse_params(params, T)

    out = multi_head_attention(x, tok_emb, w_packed, H, hs)
    out = jax.block_until_ready(out)

    ref = mha_reference(x, tok_emb, params)
    assert out.shape == (B, E), out.shape
    assert bool(jnp.allclose(out, ref, rtol=1e-4, atol=1e-4)), (out, ref)
    print("KERNEL_OK")
</pallas_src>

<mosaic_0001>
module attributes {stable_mosaic.version = 11 : i64} {
  func.func @kernel(%arg0: memref<2x16xf32, #tpu.memory_space<vmem>>, %arg1: memref<8x16xf32, #tpu.memory_space<vmem>>, %arg2: memref<152x32xf32, #tpu.memory_space<vmem>>, %arg3: memref<2x16xf32, #tpu.memory_space<vmem>>) attributes {dimension_semantics = [], scalar_prefetch = 0 : i64, scratch_operands = 0 : i64, tpu.core_type = #tpu.core_type<tc>} {
    %c0 = arith.constant 0 : index
    %c0_0 = arith.constant 0 : index
    %0 = vector.load %arg0[%c0, %c0_0] : memref<2x16xf32, #tpu.memory_space<vmem>>, vector<2x16xf32>
    %c0_1 = arith.constant 0 : index
    %c0_2 = arith.constant 0 : index
    %1 = vector.load %arg1[%c0_1, %c0_2] : memref<8x16xf32, #tpu.memory_space<vmem>>, vector<8x16xf32>
    %c0_3 = arith.constant 0 : index
    %c0_4 = arith.constant 0 : index
    %2 = vector.load %arg2[%c0_3, %c0_4] : memref<152x32xf32, #tpu.memory_space<vmem>>, vector<16x8xf32>
    %c16 = arith.constant 16 : index
    %c0_5 = arith.constant 0 : index
    %3 = vector.load %arg2[%c16, %c0_5] : memref<152x32xf32, #tpu.memory_space<vmem>>, vector<1x8xf32>
    %c24 = arith.constant 24 : index
    %c0_6 = arith.constant 0 : index
    %4 = vector.load %arg2[%c24, %c0_6] : memref<152x32xf32, #tpu.memory_space<vmem>>, vector<16x32xf32>
    %c40 = arith.constant 40 : index
    %c0_7 = arith.constant 0 : index
    %5 = vector.load %arg2[%c40, %c0_7] : memref<152x32xf32, #tpu.memory_space<vmem>>, vector<32x32xf32>
    %c72 = arith.constant 72 : index
    %c0_8 = arith.constant 0 : index
    %6 = vector.load %arg2[%c72, %c0_8] : memref<152x32xf32, #tpu.memory_space<vmem>>, vector<1x32xf32>
    %c80 = arith.constant 80 : index
    %c0_9 = arith.constant 0 : index
    %7 = vector.load %arg2[%c80, %c0_9] : memref<152x32xf32, #tpu.memory_space<vmem>>, vector<64x16xf32>
    %c144 = arith.constant 144 : index
    %c0_10 = arith.constant 0 : index
    %8 = vector.load %arg2[%c144, %c0_10] : memref<152x32xf32, #tpu.memory_space<vmem>>, vector<1x16xf32>
    %cst = arith.constant dense<0.000000e+00> : vector<8x8xf32>
    %9 = tpu.matmul %1, %2, %cst {dimension_numbers = #tpu.dot_dimension_numbers<[1], [0], [0], [1], [0, 0, 1, 1], [], []>} : vector<8x16xf32>, vector<16x8xf32>, vector<8x8xf32> -> vector<8x8xf32>
    %10 = vector.broadcast %3 : vector<1x8xf32> to vector<8x8xf32>
    %11 = arith.addf %9, %10 : vector<8x8xf32>
    %12 = tpu.transpose %11, [1, 0] : vector<8x8xf32> -> vector<8x8xf32>
    %13 = vector.extract_strided_slice %12 {offsets = [0, 0], sizes = [1, 8], strides = [1, 1]} : vector<8x8xf32> to vector<1x8xf32>
    %14 = vector.extract_strided_slice %12 {offsets = [1, 0], sizes = [1, 8], strides = [1, 1]} : vector<8x8xf32> to vector<1x8xf32>
    %15 = vector.extract_strided_slice %12 {offsets = [2, 0], sizes = [1, 8], strides = [1, 1]} : vector<8x8xf32> to vector<1x8xf32>
    %16 = vector.extract_strided_slice %12 {offsets = [3, 0], sizes = [1, 8], strides = [1, 1]} : vector<8x8xf32> to vector<1x8xf32>
    %17 = tpu.concatenate %13, %14, %15, %16 in 1 : vector<1x8xf32>, vector<1x8xf32>, vector<1x8xf32>, vector<1x8xf32> -> vector<1x32xf32>
    %18 = vector.extract_strided_slice %12 {offsets = [4, 0], sizes = [1, 8], strides = [1, 1]} : vector<8x8xf32> to vector<1x8xf32>
    %19 = vector.extract_strided_slice %12 {offsets = [5, 0], sizes = [1, 8], strides = [1, 1]} : vector<8x8xf32> to vector<1x8xf32>
    %20 = vector.extract_strided_slice %12 {offsets = [6, 0], sizes = [1, 8], strides = [1, 1]} : vector<8x8xf32> to vector<1x8xf32>
    %21 = vector.extract_strided_slice %12 {offsets = [7, 0], sizes = [1, 8], strides = [1, 1]} : vector<8x8xf32> to vector<1x8xf32>
    %22 = tpu.concatenate %18, %19, %20, %21 in 1 : vector<1x8xf32>, vector<1x8xf32>, vector<1x8xf32>, vector<1x8xf32> -> vector<1x32xf32>
    %23 = vector.shape_cast %0 : vector<2x16xf32> to vector<2x16x1xf32>
    %24 = vector.shape_cast %17 : vector<1x32xf32> to vector<1x1x32xf32>
    %25 = vector.broadcast %23 : vector<2x16x1xf32> to vector<2x16x32xf32>
    %26 = vector.broadcast %24 : vector<1x1x32xf32> to vector<2x16x32xf32>
    %27 = arith.mulf %25, %26 : vector<2x16x32xf32>
    %28 = vector.shape_cast %22 : vector<1x32xf32> to vector<1x1x32xf32>
    %29 = vector.broadcast %28 : vector<1x1x32xf32> to vector<2x16x32xf32>
    %30 = arith.addf %27, %29 : vector<2x16x32xf32>
    %cst_11 = arith.constant dense<0xFF800000> : vector<2x32xf32>
    %31 = vector.multi_reduction <maximumf>, %30, %cst_11 [1] : vector<2x16x32xf32> to vector<2x32xf32>
    %32 = vector.shape_cast %31 : vector<2x32xf32> to vector<2x1x32xf32>
    %33 = vector.broadcast %32 : vector<2x1x32xf32> to vector<2x16x32xf32>
    %34 = arith.subf %30, %33 : vector<2x16x32xf32>
    %35 = math.exp %34 : vector<2x16x32xf32>
    %cst_12 = arith.constant dense<0.000000e+00> : vector<2x32xf32>
    %36 = vector.multi_reduction <add>, %35, %cst_12 [1] : vector<2x16x32xf32> to vector<2x32xf32>
    %37 = vector.shape_cast %36 : vector<2x32xf32> to vector<2x1x32xf32>
    %38 = vector.broadcast %37 : vector<2x1x32xf32> to vector<2x16x32xf32>
    %39 = arith.divf %35, %38 : vector<2x16x32xf32>
    %cst_13 = arith.constant dense<0.000000e+00> : vector<8x32xf32>
    %40 = tpu.matmul %1, %4, %cst_13 {dimension_numbers = #tpu.dot_dimension_numbers<[1], [0], [0], [1], [0, 0, 1, 1], [], []>} : vector<8x16xf32>, vector<16x32xf32>, vector<8x32xf32> -> vector<8x32xf32>
    %41 = math.tanh %40 : vector<8x32xf32>
    %42 = tpu.concatenate %41, %41, %41, %41 in 0 : vector<8x32xf32>, vector<8x32xf32>, vector<8x32xf32>, vector<8x32xf32> -> vector<32x32xf32>
    %43 = arith.mulf %42, %5 : vector<32x32xf32>
    %44 = vector.shape_cast %39 : vector<2x16x32xf32> to vector<32x32xf32>
    %cst_14 = arith.constant dense<0.000000e+00> : vector<32x32xf32>
    %45 = tpu.matmul %44, %43, %cst_14 {dimension_numbers = #tpu.dot_dimension_numbers<[1], [0], [0], [1], [0, 0, 1, 1], [], []>} : vector<32x32xf32>, vector<32x32xf32>, vector<32x32xf32> -> vector<32x32xf32>
    %46 = math.tanh %45 : vector<32x32xf32>
    %47 = vector.shape_cast %46 : vector<32x32xf32> to vector<2x16x32xf32>
    %48 = vector.extract_strided_slice %47 {offsets = [0, 0, 0], sizes = [2, 16, 8], strides = [1, 1, 1]} : vector<2x16x32xf32> to vector<2x16x8xf32>
    %49 = vector.extract_strided_slice %6 {offsets = [0, 0], sizes = [1, 8], strides = [1, 1]} : vector<1x32xf32> to vector<1x8xf32>
    %50 = vector.shape_cast %49 : vector<1x8xf32> to vector<1x1x8xf32>
    %51 = vector.broadcast %50 : vector<1x1x8xf32> to vector<2x16x8xf32>
    %52 = arith.mulf %48, %51 : vector<2x16x8xf32>
    %cst_15 = arith.constant dense<0.000000e+00> : vector<2x16xf32>
    %53 = vector.multi_reduction <add>, %52, %cst_15 [2] : vector<2x16x8xf32> to vector<2x16xf32>
    %54 = vector.extract_strided_slice %47 {offsets = [0, 0, 8], sizes = [2, 16, 8], strides = [1, 1, 1]} : vector<2x16x32xf32> to vector<2x16x8xf32>
    %55 = vector.extract_strided_slice %6 {offsets = [0, 8], sizes = [1, 8], strides = [1, 1]} : vector<1x32xf32> to vector<1x8xf32>
    %56 = vector.shape_cast %55 : vector<1x8xf32> to vector<1x1x8xf32>
    %57 = vector.broadcast %56 : vector<1x1x8xf32> to vector<2x16x8xf32>
    %58 = arith.mulf %54, %57 : vector<2x16x8xf32>
    %cst_16 = arith.constant dense<0.000000e+00> : vector<2x16xf32>
    %59 = vector.multi_reduction <add>, %58, %cst_16 [2] : vector<2x16x8xf32> to vector<2x16xf32>
    %60 = vector.extract_strided_slice %47 {offsets = [0, 0, 16], sizes = [2, 16, 8], strides = [1, 1, 1]} : vector<2x16x32xf32> to vector<2x16x8xf32>
    %61 = vector.extract_strided_slice %6 {offsets = [0, 16], sizes = [1, 8], strides = [1, 1]} : vector<1x32xf32> to vector<1x8xf32>
    %62 = vector.shape_cast %61 : vector<1x8xf32> to vector<1x1x8xf32>
    %63 = vector.broadcast %62 : vector<1x1x8xf32> to vector<2x16x8xf32>
    %64 = arith.mulf %60, %63 : vector<2x16x8xf32>
    %cst_17 = arith.constant dense<0.000000e+00> : vector<2x16xf32>
    %65 = vector.multi_reduction <add>, %64, %cst_17 [2] : vector<2x16x8xf32> to vector<2x16xf32>
    %66 = vector.extract_strided_slice %47 {offsets = [0, 0, 24], sizes = [2, 16, 8], strides = [1, 1, 1]} : vector<2x16x32xf32> to vector<2x16x8xf32>
    %67 = vector.extract_strided_slice %6 {offsets = [0, 24], sizes = [1, 8], strides = [1, 1]} : vector<1x32xf32> to vector<1x8xf32>
    %68 = vector.shape_cast %67 : vector<1x8xf32> to vector<1x1x8xf32>
    %69 = vector.broadcast %68 : vector<1x1x8xf32> to vector<2x16x8xf32>
    %70 = arith.mulf %66, %69 : vector<2x16x8xf32>
    %cst_18 = arith.constant dense<0.000000e+00> : vector<2x16xf32>
    %71 = vector.multi_reduction <add>, %70, %cst_18 [2] : vector<2x16x8xf32> to vector<2x16xf32>
    %72 = tpu.concatenate %53, %59, %65, %71 in 1 : vector<2x16xf32>, vector<2x16xf32>, vector<2x16xf32>, vector<2x16xf32> -> vector<2x64xf32>
    %cst_19 = arith.constant dense<0.000000e+00> : vector<2x16xf32>
    %73 = tpu.matmul %72, %7, %cst_19 {dimension_numbers = #tpu.dot_dimension_numbers<[1], [0], [0], [1], [0, 0, 1, 1], [], []>} : vector<2x64xf32>, vector<64x16xf32>, vector<2x16xf32> -> vector<2x16xf32>
    %74 = vector.broadcast %8 : vector<1x16xf32> to vector<2x16xf32>
    %75 = arith.addf %73, %74 : vector<2x16xf32>
    %c0_20 = arith.constant 0 : index
    %c0_21 = arith.constant 0 : index
    %76 = vector.load %arg3[%c0_20, %c0_21] : memref<2x16xf32, #tpu.memory_space<vmem>>, vector<2x16xf32>
    tpu.vector_store %arg3[%c0_20, %c0_21], %75 {strides = array<i32>} : memref<2x16xf32, #tpu.memory_space<vmem>>, vector<2x16xf32>,
    return
  }
}

</mosaic_0001>

<bundles_post_ra>
// kernel: tpu_custom_call.1
= control target key start
LH: loop header
LB: loop body
LE: loop exit
PB: predicated region body
PF: predicated region fallthrough
CT: control target
= control target key end

     0   :  { %v899_v2 = vmov 0.0|0.0   ;;  %vm900_vm0 = vmmov 0   ;;  %v901_v4 = vmov 0.0   ;;  %s1072_s0 = inlined_call_operand.vmem [shape: f32[2,16], index: 0, kind: input, shape index: {}]   ;;  %s1073_s1 = inlined_call_operand.vmem [shape: f32[8,16], index: 1, kind: input, shape index: {}]   ;;  %s1074_s2 = inlined_call_operand.vmem [shape: f32[152,32], index: 2, kind: input, shape index: {}]   ;;  %s1075_s3 = inlined_call_operand.hbm [shape: f32[2,16], index: 3, kind: output, shape index: {}]  }
   0x1   :  { %v17_v0 = vld [vmem:[%s1074_s2] sm:$0xff]  ;;  %v18_v1 = vld [vmem:[%s1074_s2 + $0x8] sm:$0xff]  ;;  %817 = vmatprep.subr.bf16.mxu0 %v899_v2  ;;  %774 = vmatprep.mubr.msk.f32.mxu0 %vm900_vm0, %v901_v4 }
   0x2   :  { %v818_v3 = vpack.c.bf16 %v18_v1, %v17_v0 }
   0x3   :  { %8 = vsyncpa [#allocation3], 0  ;;  %820 = vmatprep.subr.bf16.mxu1 %v899_v2  ;;  %781 = vmatprep.mubr.msk.f32.mxu1 %vm900_vm0, %v901_v4  ;;  %v16_v5 = vld [vmem:[%s1073_s1] sm:$0xff]  ;;  %vm40_vm1 = vcmask 130048   ;;  %v20_v6 = vld [vmem:[%s1074_s2 + $0x18] sm:$0xff]  ;;  %v164_v8 = vlaneseq  ;;  %s903_s25 = smov 16  }
   0x4   :  { %819 = vmatpush3.bf16.msra.mxu0 %v818_v3  ;;  %v21_v7 = vld [vmem:[%s1074_s2 + $0x20] sm:$0xff]  ;;  %v737_v14 = vld [vmem:[%s1074_s2 + $0x10] ss:$0 sm:$0xff]  ;;  %s904_s26 = smov 24   ;;  %v22_v27 = vld [vmem:[%s1074_s2 + $0x28] sm:$0xff]  ;;  %vm159_vm2 = vcmask 64512  }
   0x5   :  { %v821_v9 = vpack.c.bf16 %v21_v7, %v20_v6  ;;  %v950_v10 = vshrl.u32 %v164_v8, 7  ;;  %v15_v11 = vld [vmem:[%s1072_s0] sm:$0x3]  ;;  %s902_s0 = smov 8   ;;  %v23_v28 = vld [vmem:[%s1074_s2 + $0x30] sm:$0xff]  ;;  %v24_v31 = vld [vmem:[%s1074_s2 + $0x38] sm:$0xff] }
   0x6   :  { %v25_v32 = vld [vmem:[%s1074_s2 + $0x40] sm:$0xff]  ;;  %vm162_vm3 = vcmask 195584   ;;  %vm202_vm4 = vcmask 261120   ;;  %s905_s10 = smov 120   ;;  %s906_s11 = smov 104   ;;  %vm544_vm5 = vcmask 130112  }
   0x7   :  { %775 = vmatmul.mubr.msk.f32.vlgmr.msra.gmra.mrb[0].mxu0 %vm40_vm1, %v16_v5  ;;  %822 = vmatpush3.bf16.msra.mxu1 %v821_v9  ;;  %v166_v12 = vsub.s32 0, %v950_v10  ;;  %v177_v21 = vsub.s32 1, %v950_v10  ;;  %v196_v43 = vsub.s32 4, %v950_v10  ;;  %s907_s12 = smov 112   ;;  %vm572_vm6 = vcmask 261312   ;;  %s908_s29 = smov [#allocation2]  }
   0x8   :  { %831 = vmatprep.subr.bf16.mxu1 %v899_v2  ;;  %vm599_vm7 = vcmask 392512   ;;  %vm555_vm8 = vcmask 1041409   ;;  %vm626_vm9 = vcmask 523712   ;;  %vm641_vm10 = vcmask 392192   ;;  %s729_s30 = sshll.u32 %s908_s29, 4  ;;  %s730_s30 = int_to_ptr.vmem [resolvable:$true] %s729_s30 }
   0x9   :  { %v167_v13 = vrot.slane %v15_v11, %v166_v12  ;;  %v178_v23 = vrot.slane %v15_v11, %v177_v21  ;;  %vm647_vm11 = vcmask 523264   ;;  %vm721_vm12 = vcmask 123904   ;;  %s875_s4 = scalar_lea.vmem %s730_s30, 32  ;;  %p880_p1 = scmp.lt.s32.totalorder %s730_s30, %s730_s30 }
   0xa   :  { %782 = vmatmul.mubr.msk.f32.vlgmr.msra.gmra.mrb[0].mxu1 %vm40_vm1, %v16_v5  ;;  %p876_p0 = scmp.ne.s32.totalorder %s730_s30, %s875_s4  ;;  %p881_p2 = scmp.lt.s32.totalorder %s875_s4, %s875_s4 }
   0xb   :  { %814 = vmatprep.mubr.msk.f32.mxu1 %vm900_vm0, %v901_v4  ;;  %169 = vbcast.lane.b32.xlu1 %v167_v13, 256 }
   0xc   :  { %p882_p3 = por %p881_p2, %p880_p1 }
   0xe   :  { %p883_p4 = pnand %p882_p3, %p876_p0 }
   0xf   :  { %173 = vbcast.lane.b32.xlu1 %v167_v13, 264 }
  0x7d   :  { %v170_v37 = vpop.permute.xlu1 %169 }
  0x81   :  { %v174_v38 = vpop.permute.xlu1 %173 }
  0xda   :  { %v110_v15 = vpop.f32.mrb[0].mxu0 }
  0xdb   :  { %v776_v16 = vpop.f32.mrb[1].mxu0  ;;  %v111_v17 = vadd.f32 %v737_v14, %v110_v15 }
  0xdd   :  { %114 = vxpose.xlu0.b32.start.end [1/1] (short) (narrow) %v111_v17, 8  ;;  %v323_v24 = vpop.f32.mrb[0].mxu1 }
  0xde   :  { %853 = vtanh.f32 %v323_v24  ;;  %v783_v25 = vpop.f32.mrb[1].mxu1 }
  0xe8   :  { %v854_v26 = vpop.eup %853 }
  0xe9   :  { %v328_v29 = vmul.f32 %v854_v26, %v22_v27  ;;  %v329_v30 = vmul.f32 %v854_v26, %v23_v28  ;;  %v330_v33 = vmul.f32 %v854_v26, %v24_v31  ;;  %v331_v34 = vmul.f32 %v854_v26, %v25_v32 }
  0xeb   :  { %v823_v35 = vpack.c.bf16 %v329_v30, %v328_v29  ;;  %v827_v36 = vpack.c.bf16 %v331_v34, %v330_v33 }
  0xed   :  { %824 = vmatprep.subr.bf16.mxu0 %v823_v35 }
  0xee   :  { %826 = vmatpush3.bf16.msra.mxu0 %v823_v35 }
  0xef   :  { %828 = vmatprep.subr.bf16.mxu0 %v827_v36 }
  0xf2   :  { %830 = vmatpush3.bf16.msra.mxu0 %v827_v36 }
 0x15d   :  { %v130_v18 = vpop.trf.xlu0 }
 0x15e   :  { %v147_v19 = vrot.slane %v130_v18, 1  ;;  %v151_v20 = vrot.slane %v130_v18, 2  ;;  %v155_v22 = vrot.slane %v130_v18, 3 }
 0x160   :  { %148 = vrot.lane.b32.xlu0 %v147_v19, %s902_s0  ;;  %152 = vrot.lane.b32.xlu1 %v151_v20, %s903_s25 }
 0x164   :  { %156 = vrot.lane.b32.xlu1 %v155_v22, %s904_s26 }
 0x168   :  { %180 = vbcast.lane.b32.xlu1 %v178_v23, 256 }
 0x16c   :  { %184 = vbcast.lane.b32.xlu1 %v178_v23, 264 }
 0x1d2   :  { %v149_v39 = vpop.permute.xlu0 %148  ;;  %v153_v40 = vpop.permute.xlu1 %152 }
 0x1d3   :  { %v160_v41 = vsel %vm159_vm2, %v130_v18, %v149_v39 }
 0x1d4   :  { %v161_v42 = vsel %vm40_vm1, %v160_v41, %v153_v40 }
 0x1d6   :  { %v157_v44 = vpop.permute.xlu1 %156 }
 0x1d7   :  { %v163_v45 = vsel %vm162_vm3, %v161_v42, %v157_v44 }
 0x1d8   :  { %v189_v46 = vrot.slane %v163_v45, %v166_v12  ;;  %v197_v49 = vrot.slane %v163_v45, %v196_v43 }
 0x1da   :  { %v190_v47 = vmul.f32 %v189_v46, %v170_v37  ;;  %v191_v48 = vmul.f32 %v189_v46, %v174_v38  ;;  %v181_v50 = vpop.permute.xlu1 %180 }
 0x1db   :  { %v192_v51 = vmul.f32 %v189_v46, %v181_v50 }
 0x1dc   :  { %v198_v52 = vadd.f32 %v197_v49, %v190_v47  ;;  %v199_v53 = vadd.f32 %v197_v49, %v191_v48 }
 0x1dd   :  { %v200_v58 = vadd.f32 %v197_v49, %v192_v51 }
 0x1de   :  { %v203_v54 = vsel %vm202_vm4, %v198_v52, -inf  ;;  %v204_v55 = vsel %vm202_vm4, %v199_v53, -inf  ;;  %v185_v56 = vpop.permute.xlu1 %184 }
 0x1df   :  { %v205_v57 = vmax.f32 %v203_v54, %v204_v55  ;;  %v193_v59 = vmul.f32 %v189_v46, %v185_v56  ;;  %v212_v63 = vsel %vm202_vm4, %v200_v58, -inf  ;;  %v744_v55 = vld [vmem:[%s1074_s2 + $0x48] ss:$0 sm:$0xff] }
 0x1e1   :  { %v206_v60 = vrot.slane %v205_v57, 4  ;;  %v201_v61 = vadd.f32 %v197_v49, %v193_v59 }
 0x1e3   :  { %v207_v62 = vmax.f32 %v205_v57, %v206_v60  ;;  %v213_v0 = vsel %vm202_vm4, %v201_v61, -inf }
 0x1e4   :  { %v214_v1 = vmax.f32 %v212_v63, %v213_v0 }
 0x1e5   :  { %v208_v3 = vrot.slane %v207_v62, 2 }
 0x1e6   :  { %v215_v4 = vrot.slane %v214_v1, 4 }
 0x1e7   :  { %v209_v5 = vmax.f32 %v207_v62, %v208_v3 }
 0x1e8   :  { %v216_v6 = vmax.f32 %v214_v1, %v215_v4 }
 0x1e9   :  { %v210_v7 = vrot.slane %v209_v5, 1 }
 0x1ea   :  { %v217_v9 = vrot.slane %v216_v6, 2 }
 0x1eb   :  { %v211_v11 = vmax.f32 %v209_v5, %v210_v7 }
 0x1ec   :  { %v218_v12 = vmax.f32 %v216_v6, %v217_v9 }
 0x1ed   :  { %v221_v13 = vsub.f32 %v198_v52, %v211_v11  ;;  %v222_v14 = vsub.f32 %v199_v53, %v211_v11 }
 0x1ee   :  { %v219_v15 = vrot.slane %v218_v12, 1 }
 0x1ef   :  { %v225_v16 = vmul.f32 1.442695, %v221_v13  ;;  %v227_v17 = vmul.f32 1.442695, %v222_v14 }
 0x1f0   :  { %v220_v18 = vmax.f32 %v218_v12, %v219_v15 }
 0x1f1   :  { %855 = vpow2.f32 %v225_v16 }
 0x1f2   :  { %857 = vpow2.f32 %v227_v17  ;;  %v223_v19 = vsub.f32 %v200_v58, %v220_v18  ;;  %v224_v20 = vsub.f32 %v201_v61, %v220_v18 }
 0x1f4   :  { %v229_v21 = vmul.f32 1.442695, %v223_v19  ;;  %v231_v22 = vmul.f32 1.442695, %v224_v20 }
 0x1f6   :  { %859 = vpow2.f32 %v229_v21 }
 0x1f7   :  { %861 = vpow2.f32 %v231_v22 }
 0x1fb   :  { %v856_v23 = vpop.eup %855 }
 0x1fc   :  { %v858_v24 = vpop.eup %857  ;;  %v233_v25 = vsel %vm202_vm4, %v856_v23, 0.0 }
 0x1fd   :  { %v234_v26 = vsel %vm202_vm4, %v858_v24, 0.0 }
 0x1fe   :  { %v235_v27 = vadd.f32 %v234_v26, %v233_v25 }
 0x200   :  { %v860_v28 = vpop.eup %859  ;;  %v236_v29 = vrot.slane %v235_v27, 4 }
 0x201   :  { %v862_v30 = vpop.eup %861  ;;  %v242_v31 = vsel %vm202_vm4, %v860_v28, 0.0 }
 0x202   :  { %v243_v32 = vsel %vm202_vm4, %v862_v30, 0.0  ;;  %v237_v33 = vadd.f32 %v236_v29, %v235_v27 }
 0x203   :  { %v244_v34 = vadd.f32 %v243_v32, %v242_v31  ;;  %v27_v31 = vld [vmem:[%s1074_s2 + $0x50] sm:$0xff]  ;;  %v28_v32 = vld [vmem:[%s1074_s2 + $0x58] sm:$0xff] }
 0x204   :  { %v238_v35 = vrot.slane %v237_v33, 2 }
 0x205   :  { %v245_v36 = vrot.slane %v244_v34, 4 }
 0x206   :  { %v239_v37 = vadd.f32 %v238_v35, %v237_v33  ;;  %v832_v33 = vpack.c.bf16 %v28_v32, %v27_v31  ;;  %v30_v35 = vld [vmem:[%s1074_s2 + $0x68] sm:$0xff] }
 0x207   :  { %v246_v38 = vadd.f32 %v245_v36, %v244_v34  ;;  %v29_v34 = vld [vmem:[%s1074_s2 + $0x60] sm:$0xff] }
 0x208   :  { %v240_v39 = vrot.slane %v239_v37, 1  ;;  %833 = vmatpush3.bf16.msra.mxu1 %v832_v33  ;;  %v835_v36 = vpack.c.bf16 %v30_v35, %v29_v34 }
 0x209   :  { %v247_v40 = vrot.slane %v246_v38, 2  ;;  %834 = vmatprep.subr.bf16.mxu1 %v899_v2 }
 0x20a   :  { %v241_v41 = vadd.f32 %v240_v39, %v239_v37  ;;  %v31_v37 = vld [vmem:[%s1074_s2 + $0x70] sm:$0xff] }
 0x20b   :  { %v248_v42 = vadd.f32 %v247_v40, %v246_v38  ;;  %v32_v38 = vld [vmem:[%s1074_s2 + $0x78] sm:$0xff]  ;;  %v33_v40 = vld [vmem:[%s1074_s2 + $0x80] sm:$0xff] }
 0x20c   :  { %863 = vrcp.f32 %v241_v41  ;;  %836 = vmatpush3.bf16.msra.mxu1 %v835_v36  ;;  %v838_v39 = vpack.c.bf16 %v32_v38, %v31_v37  ;;  %v34_v41 = vld [vmem:[%s1074_s2 + $0x88] sm:$0xff] }
 0x20d   :  { %v249_v43 = vrot.slane %v248_v42, 1  ;;  %837 = vmatprep.subr.bf16.mxu1 %v899_v2 }
 0x20f   :  { %v250_v44 = vadd.f32 %v249_v43, %v248_v42  ;;  %v841_v42 = vpack.c.bf16 %v34_v41, %v33_v40 }
 0x210   :  { %839 = vmatpush3.bf16.msra.mxu1 %v838_v39 }
 0x211   :  { %865 = vrcp.f32 %v250_v44  ;;  %840 = vmatprep.subr.bf16.mxu1 %v899_v2  ;;  %v534_v2 = vand.u32 127, %v164_v8 }
 0x214   :  { %842 = vmatpush3.bf16.msra.mxu1 %v841_v42  ;;  %v745_v42 = vld [vmem:[%s1074_s2 + $0x90] ss:$0 sm:$0xff] }
 0x216   :  { %v864_v45 = vpop.eup %863 }
 0x217   :  { %v252_v46 = vmul.f32 %v864_v45, %v856_v23  ;;  %v253_v47 = vmul.f32 %v864_v45, %v858_v24 }
 0x219   :  { %792 = vmatprep.mubr.msk.f32.mxu0 %vm202_vm4, %v252_v46 }
 0x21a   :  { %793 = vmatmul.mubr.msk.f32.vlgmr.msra.gmra.mrb[2].mxu0 %vm202_vm4, %v253_v47 }
 0x21b   :  { %v866_v48 = vpop.eup %865 }
 0x21c   :  { %v255_v49 = vmul.f32 %v866_v48, %v860_v28  ;;  %v256_v50 = vmul.f32 %v866_v48, %v862_v30 }
 0x21e   :  { %795 = vmatprep.mubr.msk.f32.mxu0 %vm202_vm4, %v255_v49 }
 0x21f   :  { %796 = vmatmul.mubr.msk.f32.gmra.mrb[4].mxu0 %vm202_vm4, %v256_v50 }
 0x2ed   :  { %v794_v51 = vpop.f32.mrb[2].mxu0 }
 0x2ee   :  { %867 = vtanh.f32 %v794_v51  ;;  %v410_v52 = vpop.f32.mrb[3].mxu0 }
 0x2ef   :  { %869 = vtanh.f32 %v410_v52  ;;  %v562_v52 = vadd.s32 4294967280, %v534_v2 }
 0x2f2   :  { %v797_v53 = vpop.f32.mrb[4].mxu0 }
 0x2f3   :  { %v420_v54 = vpop.f32.mrb[5].mxu0 }
 0x2f4   :  { %871 = vtanh.f32 %v420_v54 }
 0x2f5   :  { %873 = vtanh.f32 %v797_v53  ;;  %v589_v53 = vadd.s32 4294967264, %v534_v2 }
 0x2f8   :  { %v868_v56 = vpop.eup %867 }
 0x2f9   :  { %v870_v57 = vpop.eup %869  ;;  %v438_v58 = vmul.f32 %v868_v56, %v744_v55  ;;  %v539_v56 = vadd.s32 4294967288, %v534_v2 }
 0x2fa   :  { %v437_v59 = vmul.f32 %v870_v57, %v744_v55  ;;  %v567_v57 = vadd.s32 4294967272, %v534_v2 }
 0x2fb   :  { %459 = vrot.lane.b32.xlu1 %v438_v58, %s905_s10  ;;  %v444_v4 = vsel %vm159_vm2, %v438_v58, 0.0 }
 0x2fc   :  { %505 = vrot.lane.b32.xlu0 %v437_v59, %s906_s11  ;;  %v441_v0 = vsel %vm159_vm2, %v437_v59, 0.0  ;;  %v570_v8 = vsub.s32 %v567_v57, %v950_v10 }
 0x2fe   :  { %v872_v60 = vpop.eup %871 }
 0x2ff   :  { %483 = vrot.lane.b32.xlu1 %v438_v58, %s907_s12  ;;  %v439_v61 = vmul.f32 %v872_v60, %v744_v55  ;;  %v874_v62 = vpop.eup %873  ;;  %v565_v60 = vsub.s32 %v562_v52, %v950_v10 }
 0x300   :  { %v440_v63 = vmul.f32 %v874_v62, %v744_v55  ;;  %v537_v62 = vsub.s32 %v534_v2, %v950_v10 }
 0x301   :  { %485 = vrot.lane.b32.xlu0 %v439_v61, %s907_s12  ;;  %v447_v3 = vsel %vm159_vm2, %v439_v61, 0.0 }
 0x302   :  { %v450_v1 = vsel %vm159_vm2, %v440_v63, 0.0 }
 0x303   :  { %507 = vrot.lane.b32.xlu1 %v438_v58, %s906_s11  ;;  %v594_v58 = vadd.s32 4294967256, %v534_v2 }
 0x305   :  { %509 = vrot.lane.b32.xlu0 %v439_v61, %s906_s11 }
 0x307   :  { %457 = vrot.lane.b32.xlu1 %v437_v59, %s905_s10 }
 0x30b   :  { %481 = vrot.lane.b32.xlu1 %v437_v59, %s907_s12  ;;  %v621_v59 = vadd.s32 4294967240, %v534_v2 }
 0x30f   :  { %463 = vrot.lane.b32.xlu1 %v440_v63, %s905_s10 }
 0x313   :  { %487 = vrot.lane.b32.xlu1 %v440_v63, %s907_s12 }
 0x317   :  { %461 = vrot.lane.b32.xlu1 %v439_v61, %s905_s10  ;;  %v616_v61 = vadd.s32 4294967248, %v534_v2 }
 0x31b   :  { %511 = vrot.lane.b32.xlu1 %v440_v63, %s906_s11  ;;  %v592_v63 = vsub.s32 %v589_v53, %v950_v10 }
 0x324   :  { %442 = vadd.xlane.f32.xlu0 %v441_v0 }
 0x328   :  { %451 = vadd.xlane.f32.xlu0 %v450_v1  ;;  %v542_v1 = vsub.s32 %v539_v56, %v950_v10 }
 0x32c   :  { %448 = vadd.xlane.f32.xlu0 %v447_v3 }
 0x33f   :  { %445 = vadd.xlane.f32.xlu1 %v444_v4  ;;  %v597_v4 = vsub.s32 %v594_v58, %v950_v10 }
 0x36d   :  { %v460_v5 = vpop.permute.xlu1 %459 }
 0x36e   :  { %v472_v6 = vsel %vm159_vm2, %v460_v5, 0.0  ;;  %v506_v17 = vpop.permute.xlu0 %505  ;;  %v624_v5 = vsub.s32 %v621_v59, %v950_v10 }
 0x36f   :  { %473 = vadd.xlane.f32.xlu1 %v472_v6  ;;  %v517_v19 = vsel %vm159_vm2, %v506_v17, 0.0 }
 0x371   :  { %v484_v7 = vpop.permute.xlu1 %483 }
 0x372   :  { %v496_v9 = vsel %vm159_vm2, %v484_v7, 0.0 }
 0x373   :  { %497 = vadd.xlane.f32.xlu1 %v496_v9  ;;  %v486_v23 = vpop.permute.xlu0 %485 }
 0x374   :  { %v499_v27 = vsel %vm159_vm2, %v486_v23, 0.0 }
 0x375   :  { %v508_v11 = vpop.permute.xlu1 %507 }
 0x376   :  { %v520_v12 = vsel %vm159_vm2, %v508_v11, 0.0  ;;  %v619_v11 = vsub.s32 %v616_v61, %v950_v10 }
 0x377   :  { %521 = vadd.xlane.f32.xlu1 %v520_v12  ;;  %v510_v29 = vpop.permute.xlu0 %509 }
 0x378   :  { %v523_v30 = vsel %vm159_vm2, %v510_v29, 0.0 }
 0x379   :  { %v458_v13 = vpop.permute.xlu1 %457 }
 0x37a   :  { %v469_v14 = vsel %vm159_vm2, %v458_v13, 0.0 }
 0x37b   :  { %470 = vadd.xlane.f32.xlu0 %v469_v14 }
 0x37d   :  { %v482_v15 = vpop.permute.xlu1 %481 }
 0x37e   :  { %v493_v16 = vsel %vm159_vm2, %v482_v15, 0.0 }
 0x37f   :  { %494 = vadd.xlane.f32.xlu0 %v493_v16 }
 0x381   :  { %v464_v18 = vpop.permute.xlu1 %463 }
 0x382   :  { %v478_v20 = vsel %vm159_vm2, %v464_v18, 0.0 }
 0x383   :  { %518 = vadd.xlane.f32.xlu0 %v517_v19  ;;  %479 = vadd.xlane.f32.xlu1 %v478_v20 }
 0x385   :  { %v488_v21 = vpop.permute.xlu1 %487 }
 0x386   :  { %v502_v22 = vsel %vm159_vm2, %v488_v21, 0.0 }
 0x387   :  { %503 = vadd.xlane.f32.xlu1 %v502_v22 }
 0x389   :  { %v462_v24 = vpop.permute.xlu1 %461 }
 0x38a   :  { %v475_v25 = vsel %vm159_vm2, %v462_v24, 0.0 }
 0x38b   :  { %476 = vadd.xlane.f32.xlu0 %v475_v25 }
 0x38d   :  { %v512_v26 = vpop.permute.xlu1 %511 }
 0x38e   :  { %v526_v28 = vsel %vm159_vm2, %v512_v26, 0.0 }
 0x38f   :  { %500 = vadd.xlane.f32.xlu0 %v499_v27  ;;  %527 = vadd.xlane.f32.xlu1 %v526_v28 }
 0x393   :  { %524 = vadd.xlane.f32.xlu0 %v523_v30 }
 0x3b1   :  { %v443_v43 = vpop.xlane.xlu0 %442 }
 0x3b2   :  { %v538_v13 = vrot.slane %v443_v43, %v537_v62 }
 0x3b5   :  { %v452_v44 = vpop.xlane.xlu0 %451 }
 0x3b6   :  { %v553_v21 = vrot.slane %v452_v44, %v542_v1 }
 0x3b9   :  { %v449_v46 = vpop.xlane.xlu0 %448 }
 0x3ba   :  { %v549_v14 = vrot.slane %v449_v46, %v537_v62 }
 0x3bc   :  { %v554_v27 = vsel %vm544_vm5, %v553_v21, %v549_v14 }
 0x3cc   :  { %v446_v45 = vpop.xlane.xlu1 %445 }
 0x3cd   :  { %v543_v7 = vrot.slane %v446_v45, %v542_v1 }
 0x3cf   :  { %v545_v24 = vsel %vm544_vm5, %v543_v7, %v538_v13 }
 0x3d0   :  { %v556_v35 = vsel %vm555_vm8, %v554_v27, %v545_v24 }
 0x3fc   :  { %v474_v47 = vpop.xlane.xlu1 %473 }
 0x3fd   :  { %v571_v17 = vrot.slane %v474_v47, %v570_v8 }
 0x400   :  { %v498_v49 = vpop.xlane.xlu1 %497 }
 0x401   :  { %v598_v22 = vrot.slane %v498_v49, %v597_v4 }
 0x404   :  { %v522_v51 = vpop.xlane.xlu1 %521 }
 0x405   :  { %v625_v31 = vrot.slane %v522_v51, %v624_v5 }
 0x408   :  { %v471_v48 = vpop.xlane.xlu0 %470 }
 0x409   :  { %v566_v9 = vrot.slane %v471_v48, %v565_v60 }
 0x40b   :  { %v573_v25 = vsel %vm572_vm6, %v571_v17, %v566_v9 }
 0x40c   :  { %v495_v50 = vpop.xlane.xlu0 %494 }
 0x40d   :  { %v593_v15 = vrot.slane %v495_v50, %v592_v63 }
 0x40f   :  { %v600_v28 = vsel %vm599_vm7, %v598_v22, %v593_v15 }
 0x410   :  { %v519_v54 = vpop.xlane.xlu0 %518  ;;  %v480_v55 = vpop.xlane.xlu1 %479 }
 0x411   :  { %v581_v12 = vrot.slane %v480_v55, %v570_v8  ;;  %v620_v10 = vrot.slane %v519_v54, %v619_v11 }
 0x413   :  { %v627_v36 = vsel %vm626_vm9, %v625_v31, %v620_v10 }
 0x414   :  { %v504_v6 = vpop.xlane.xlu1 %503 }
 0x415   :  { %v608_v18 = vrot.slane %v504_v6, %v597_v4 }
 0x418   :  { %v477_v0 = vpop.xlane.xlu0 %476 }
 0x419   :  { %v577_v3 = vrot.slane %v477_v0, %v565_v60 }
 0x41b   :  { %v582_v19 = vsel %vm572_vm6, %v581_v12, %v577_v3 }
 0x41c   :  { %v501_v16 = vpop.xlane.xlu0 %500  ;;  %v528_v23 = vpop.xlane.xlu1 %527  ;;  %v583_v29 = vsel %vm555_vm8, %v582_v19, %v573_v25 }
 0x41d   :  { %v604_v20 = vrot.slane %v501_v16, %v592_v63  ;;  %v635_v33 = vrot.slane %v528_v23, %v624_v5  ;;  %v639_v37 = vsel %vm40_vm1, %v556_v35, %v583_v29 }
 0x41f   :  { %v609_v26 = vsel %vm599_vm7, %v608_v18, %v604_v20 }
 0x420   :  { %v525_v30 = vpop.xlane.xlu0 %524  ;;  %v610_v32 = vsel %vm555_vm8, %v609_v26, %v600_v28 }
 0x421   :  { %v631_v34 = vrot.slane %v525_v30, %v619_v11  ;;  %v640_v40 = vsel %vm202_vm4, %v639_v37, %v610_v32 }
 0x423   :  { %v636_v38 = vsel %vm626_vm9, %v635_v33, %v631_v34 }
 0x424   :  { %v637_v39 = vsel %vm555_vm8, %v636_v38, %v627_v36 }
 0x425   :  { %v642_v41 = vsel %vm641_vm10, %v640_v40, %v637_v39 }
 0x426   :  { %815 = vmatmul.mubr.msk.f32.vlgmr.msra.gmra.mrb[2].mxu1 %vm647_vm11, %v642_v41 }
 0x4f9   :  { %v717_v43 = vpop.f32.mrb[2].mxu1 }
 0x4fa   :  { %v718_v44 = vadd.f32 %v745_v42, %v717_v43  ;;  %v816_v45 = vpop.f32.mrb[3].mxu1 }
 0x4fc   :  { %722 = vst.msk [vmem:[#allocation2] sm:$0x3] %vm721_vm12, %v718_v44 }
 0x4fd   :  { %886 = shalt.err (!%p883_p4)
}
 0x4fe   :  { %s887_s7 = scalar_lea.hbm %s1075_s3, 32 }
 0x4ff   :  { %p888_p5 = scmp.ne.s32.totalorder %s1075_s3, %s887_s7  ;;  %p891_p6 = scmp.lt.u32.totalorder %s887_s7, %s1075_s3 }
 0x501   :  { %p893_p7 = pnand %p891_p6, %p888_p5 }
 0x503   :  { %896 = shalt.err (!%p893_p7)
}
 0x504   :  { %732 = dma.vmem_to_hbm [thread:$0]  %s730_s30, 32, %s1075_s3, [#allocation3]  }
 0x505   :  { %897 = dma.done.wait [#allocation3], 32  }
 0x506   :  { %898 = vsyncadd [#allocation3], 4294967264 }
 0x507   :  { %736 = vsyncpa [#allocation3], 1 }

</bundles_post_ra>
